<compile_context>
chip_gen: v7x
topology: tpu7x:2x2x1
jax: 0.10.0
libtpu: 0.0.40
codegen_flags: <defaults>
</compile_context>

<pallas_src>
import functools
import math

import numpy as np

import jax
import jax.numpy as jnp
from jax.experimental import pallas as pl
from jax.experimental.pallas import tpu as pltpu


# ----------------------------------------------------------------------------
# Host-side (deterministic __init__-equivalent) helpers, mirroring the PyTorch
# buffer construction.
# ----------------------------------------------------------------------------
def create_hops(num_points: int, A: np.ndarray) -> np.ndarray:
    h1 = A.sum(0)
    h1[h1 != 0] = 1
    h = [None for _ in range(num_points)]
    h[0] = np.eye(num_points)
    h[1] = h1
    hops = 0 * h[0]
    for i in range(2, num_points):
        h[i] = h[i - 1] @ h1.T
        h[i][h[i] != 0] = 1
    for i in range(num_points - 1, 0, -1):
        if np.any(h[i] - h[i - 1]):
            h[i] = h[i] - h[i - 1]
            hops += i * h[i]
    return hops


def create_relative_hop_table(max_hop: int) -> np.ndarray:
    rel = np.arange(0, max_hop + 1, dtype=np.float32)[None, :]   # (1, M)
    rel = rel / max_hop
    rel = rel * 8
    rel = (rel + 1.0) / math.log2(8)
    return rel[..., None]                                         # (1, M, 1)


def build_hop_index_row(hops_int: np.ndarray, num_frames: int) -> np.ndarray:
    """int32 row (1, N): hop id of every flattened output column.

    out[h, n] = 16*sigmoid(table[hop_of_n[n], h]) with
    n = (t1*V + i) * (T*V) + t2*V + j  (row-major flattening of (T*V, T*V)),
    so i(n) = (n // (T*V)) % V and j(n) = n % V.  This folds the table-row
    gather AND the (T, T) frame tiling into one index per output column.
    """
    V = hops_int.shape[0]
    TV = num_frames * V
    N = TV * TV
    n = np.arange(N)
    i = (n // TV) % V
    j = n % V
    return hops_int[i, j].astype(np.int32).reshape(1, N)


def _pick_lane_tile(n: int, max_tile: int) -> int:
    """Largest multiple of 128 that divides n and is <= max_tile (else n)."""
    best = 0
    t = 128
    while t <= min(n, max_tile):
        if n % t == 0:
            best = t
        t += 128
    return best if best > 0 else n


# ----------------------------------------------------------------------------
# Fused Pallas kernel: MLP + 16*sigmoid + (gather + (T,T) tile) per N-tile.
# ----------------------------------------------------------------------------
def fused_bias_kernel(rel_ref, w1_ref, b1_ref, w2_ref, hop_ref, out_ref,
                      *, num_hops: int):
    # rel: (M, 1)    relative hop values (column; broadcast along lanes)
    # w1 : (1, mlp)  Linear(1, mlp).weight as a lane-dense row
    # b1 : (1, mlp)  Linear(1, mlp).bias   as a lane-dense row
    # w2 : (Hp, mlp) Linear(mlp, H).weight zero-padded to Hp (= 8k) rows
    # hop: (1, Nt)   int32 hop id per output column of this N-tile
    # out: (Hp, Nt)  lane-dense output tile (Nt mult. of 128, Hp mult. of 8)

    # Tiny MLP, kept in a few dense vregs: hidden (M, mlp), table^T (Hp, M).
    hidden = jnp.maximum(rel_ref[...] * w1_ref[...] + b1_ref[...], 0.0)    # (M, mlp)
    table_t = jax.lax.dot_general(
        w2_ref[...], hidden,
        dimension_numbers=(((1,), (1,)), ((), ())),
        preferred_element_type=jnp.float32)                                # (Hp, M)
    act_t = 16.0 * jax.nn.sigmoid(table_t)                                 # (Hp, M)

    # Gather + (T, T) spatial tiling as `num_hops` VPU select-accumulates:
    # exact on all generations, no MXU low-fill, ~num_hops*Hp*Nt/1024 vreg ops.
    hop = hop_ref[...]                                                     # (1, Nt)
    out = jnp.zeros(out_ref.shape, jnp.float32)
    for m in range(num_hops):                      # static, fully unrolled
        out = jnp.where(hop == m, act_t[:, m:m + 1], out)
    out_ref[...] = out


# ----------------------------------------------------------------------------
# Wrapper
# ----------------------------------------------------------------------------
def hop_relative_position_bias(rel_table, w1, b1, w2, hop_row,
                               num_points, num_frames, num_heads,
                               max_lane_tile=8192):
    """Returns (num_heads, T*V, T*V) float32 bias."""
    V, T, H = num_points, num_frames, num_heads
    M = int(np.asarray(rel_table).size)
    mlp_dim = int(np.asarray(w1).shape[0])            # PyTorch Linear(1, mlp).weight
    TV = T * V
    N = TV * TV
    Hp = ((H + 7) // 8) * 8                           # pad heads to full sublanes

    rel_col = jnp.asarray(rel_table, jnp.float32).reshape(M, 1)
    w1_row = jnp.asarray(w1, jnp.float32).reshape(1, mlp_dim)
    b1_row = jnp.asarray(b1, jnp.float32).reshape(1, mlp_dim)
    w2_pad = jnp.zeros((Hp, mlp_dim), jnp.float32).at[:H, :].set(
        jnp.asarray(w2, jnp.float32).reshape(H, mlp_dim))
    hop_row = jnp.asarray(hop_row, jnp.int32).reshape(1, N)

    n_tile = _pick_lane_tile(N, max_lane_tile)        # lane-dense, divides N
    n_steps = N // n_tile

    # explicit VMEM budget (double-buffered blocks + headroom), scale-safe
    block_bytes = 4 * (M + 2 * mlp_dim + Hp * mlp_dim + n_tile + Hp * n_tile)
    vmem_limit = int(min(128 * 1024 * 1024, max(4 * 1024 * 1024, 4 * block_bytes)))

    cost = pl.CostEstimate(
        flops=2 * M * mlp_dim * n_steps + 2 * Hp * M * mlp_dim * n_steps + Hp * N * M,
        transcendentals=Hp * M * n_steps,
        bytes_accessed=4 * (M + 2 * mlp_dim + Hp * mlp_dim + N + Hp * N),
    )

    kernel = functools.partial(fused_bias_kernel, num_hops=M)

    out_flat = pl.pallas_call(
        kernel,
        out_shape=jax.ShapeDtypeStruct((Hp, N), jnp.float32),
        grid=(n_steps,),
        in_specs=[
            pl.BlockSpec((M, 1), lambda i: (0, 0)),
            pl.BlockSpec((1, mlp_dim), lambda i: (0, 0)),
            pl.BlockSpec((1, mlp_dim), lambda i: (0, 0)),
            pl.BlockSpec((Hp, mlp_dim), lambda i: (0, 0)),
            pl.BlockSpec((1, n_tile), lambda i: (0, i)),
        ],
        out_specs=pl.BlockSpec((Hp, n_tile), lambda i: (0, i)),
        compiler_params=pltpu.CompilerParams(
            dimension_semantics=("parallel",),
            vmem_limit_bytes=vmem_limit),
        cost_estimate=cost,
    )(rel_col, w1_row, b1_row, w2_pad, hop_row)

    # slice off padded heads; row-major-compatible (free) reshape
    return out_flat[:H].reshape(H, TV, TV)


# pure-JAX reference of the PyTorch forward (for correctness check)
def reference_forward(rel_col, w1, b1, w2, hops_flat, V, T, H):
    h = jnp.maximum(rel_col @ jnp.reshape(w1, (-1, 1)).T
                    + jnp.reshape(b1, (1, -1)), 0.0)                     # (M, mlp)
    table = h @ jnp.reshape(w2, (H, -1)).T                               # (M, H)
    bias = table[hops_flat].reshape(V, V, H)                             # gather
    bias = jnp.tile(bias, (T, T, 1))                                     # torch .repeat(T, T, 1)
    bias = jnp.transpose(bias, (2, 0, 1))                                # (H, T*V, T*V)
    return 16.0 * jax.nn.sigmoid(bias)


if __name__ == "__main__":
    # ---- small, deterministic configuration ---------------------------------
    num_points = 8        # V
    num_frames = 4        # T
    num_heads = 6         # H
    mlp_dim = 128

    # Simple chain-graph adjacency with self-loops, shape (3, V, V) like ST-GCN.
    V = num_points
    inward = np.zeros((V, V), dtype=np.float64)
    for i in range(1, V):
        inward[i, i - 1] = 1.0
    A = np.stack([np.eye(V), inward, inward.T], axis=0)

    hops = create_hops(num_points, A)                         # (V, V) float
    hops_int = hops.astype(np.int64)
    max_hop = int(hops_int.max())
    M = max_hop + 1
    rel_table = create_relative_hop_table(max_hop)            # (1, M, 1)
    hop_row = build_hop_index_row(hops_int, num_frames)       # (1, N) int32

    # deterministic parameter init (synthetic weights in PyTorch Linear layout)
    key = jax.random.PRNGKey(0)
    k1, k2, k3 = jax.random.split(key, 3)
    w1 = jax.random.normal(k1, (mlp_dim, 1), jnp.float32) * 0.05          # Linear(1, mlp).weight
    b1 = jax.random.normal(k2, (mlp_dim,), jnp.float32) * 0.05            # Linear(1, mlp).bias
    w2 = jax.random.normal(k3, (num_heads, mlp_dim), jnp.float32) * 0.05  # Linear(mlp, H).weight

    out = hop_relative_position_bias(rel_table, w1, b1, w2, hop_row,
                                     num_points, num_frames, num_heads)
    out = jax.block_until_ready(out)

    rel_col = jnp.asarray(rel_table.reshape(M, 1), jnp.float32)
    hops_flat = jnp.asarray(hops_int.reshape(-1), jnp.int32)
    ref = jax.block_until_ready(
        reference_forward(rel_col, w1, b1, w2, hops_flat,
                          num_points, num_frames, num_heads))

    assert out.shape == (num_heads, num_frames * num_points, num_frames * num_points)
    assert out.dtype == jnp.float32
    np.testing.assert_allclose(np.asarray(out), np.asarray(ref), rtol=1e-5, atol=1e-5)

    print("KERNEL_OK")
</pallas_src>

<mosaic_0001>
module attributes {stable_mosaic.version = 11 : i64} {
  func.func @fused_bias_kernel(%arg0: i32, %arg1: memref<8x1xf32, #tpu.memory_space<vmem>>, %arg2: memref<1x128xf32, #tpu.memory_space<vmem>>, %arg3: memref<1x128xf32, #tpu.memory_space<vmem>>, %arg4: memref<8x128xf32, #tpu.memory_space<vmem>>, %arg5: memref<1x1024xi32, #tpu.memory_space<vmem>>, %arg6: memref<8x1024xf32, #tpu.memory_space<vmem>>) attributes {dimension_semantics = [#tpu.dimension_semantics<parallel>], iteration_bounds = array<i64: 1>, scalar_prefetch = 0 : i64, scratch_operands = 0 : i64, tpu.core_type = #tpu.core_type<tc>, window_params = [{pipeline_mode = #tpu.pipeline_mode<synchronous>, transform_indices = @transform_0, window_bounds = array<i64: 8, 1>}, {pipeline_mode = #tpu.pipeline_mode<synchronous>, transform_indices = @transform_1, window_bounds = array<i64: 1, 128>}, {pipeline_mode = #tpu.pipeline_mode<synchronous>, transform_indices = @transform_2, window_bounds = array<i64: 1, 128>}, {pipeline_mode = #tpu.pipeline_mode<synchronous>, transform_indices = @transform_3, window_bounds = array<i64: 8, 128>}, {transform_indices = @transform_4, window_bounds = array<i64: 1, 1024>}, {transform_indices = @transform_5, window_bounds = array<i64: 8, 1024>}]} {
    %c0 = arith.constant 0 : index
    %c0_0 = arith.constant 0 : index
    %0 = vector.load %arg1[%c0, %c0_0] : memref<8x1xf32, #tpu.memory_space<vmem>>, vector<8x1xf32>
    %c0_1 = arith.constant 0 : index
    %c0_2 = arith.constant 0 : index
    %1 = vector.load %arg2[%c0_1, %c0_2] : memref<1x128xf32, #tpu.memory_space<vmem>>, vector<1x128xf32>
    %2 = vector.broadcast %0 : vector<8x1xf32> to vector<8x128xf32>
    %3 = vector.broadcast %1 : vector<1x128xf32> to vector<8x128xf32>
    %4 = arith.mulf %2, %3 : vector<8x128xf32>
    %c0_3 = arith.constant 0 : index
    %c0_4 = arith.constant 0 : index
    %5 = vector.load %arg3[%c0_3, %c0_4] : memref<1x128xf32, #tpu.memory_space<vmem>>, vector<1x128xf32>
    %6 = vector.broadcast %5 : vector<1x128xf32> to vector<8x128xf32>
    %7 = arith.addf %4, %6 : vector<8x128xf32>
    %cst = arith.constant 0.000000e+00 : f32
    %8 = vector.broadcast %cst : f32 to vector<8x128xf32>
    %9 = arith.maximumf %7, %8 : vector<8x128xf32>
    %c0_5 = arith.constant 0 : index
    %c0_6 = arith.constant 0 : index
    %10 = vector.load %arg4[%c0_5, %c0_6] : memref<8x128xf32, #tpu.memory_space<vmem>>, vector<8x128xf32>
    %cst_7 = arith.constant dense<0.000000e+00> : vector<8x8xf32>
    %11 = tpu.matmul %10, %9, %cst_7 {dimension_numbers = #tpu.dot_dimension_numbers<[1], [1], [0], [0], [0, 0, 1, 0], [], []>} : vector<8x128xf32>, vector<8x128xf32>, vector<8x8xf32> -> vector<8x8xf32>
    %12 = arith.negf %11 : vector<8x8xf32>
    %13 = math.exp %12 : vector<8x8xf32>
    %cst_8 = arith.constant 1.000000e+00 : f32
    %14 = vector.broadcast %cst_8 : f32 to vector<8x8xf32>
    %15 = arith.addf %14, %13 : vector<8x8xf32>
    %16 = arith.divf %14, %15 : vector<8x8xf32>
    %cst_9 = arith.constant 1.600000e+01 : f32
    %17 = vector.broadcast %cst_9 : f32 to vector<8x8xf32>
    %18 = arith.mulf %17, %16 : vector<8x8xf32>
    %c0_10 = arith.constant 0 : index
    %c0_11 = arith.constant 0 : index
    %19 = vector.load %arg5[%c0_10, %c0_11] : memref<1x1024xi32, #tpu.memory_space<vmem>>, vector<1x1024xi32>
    %cst_12 = arith.constant 0.000000e+00 : f32
    %20 = vector.broadcast %cst_12 : f32 to vector<8x1024xf32>
    %c0_i32 = arith.constant 0 : i32
    %21 = vector.broadcast %c0_i32 : i32 to vector<1x1024xi32>
    %22 = arith.cmpi eq, %19, %21 : vector<1x1024xi32>
    %23 = vector.extract_strided_slice %18 {offsets = [0, 0], sizes = [8, 1], strides = [1, 1]} : vector<8x8xf32> to vector<8x1xf32>
    %24 = vector.shape_cast %22 : vector<1x1024xi1> to vector<1x1024xi1>
    %25 = vector.broadcast %24 : vector<1x1024xi1> to vector<8x1024xi1>
    %26 = vector.shape_cast %23 : vector<8x1xf32> to vector<8x1xf32>
    %27 = vector.broadcast %26 : vector<8x1xf32> to vector<8x1024xf32>
    %28 = arith.select %25, %27, %20 : vector<8x1024xi1>, vector<8x1024xf32>
    %c1_i32 = arith.constant 1 : i32
    %29 = vector.broadcast %c1_i32 : i32 to vector<1x1024xi32>
    %30 = arith.cmpi eq, %19, %29 : vector<1x1024xi32>
    %31 = vector.extract_strided_slice %18 {offsets = [0, 1], sizes = [8, 1], strides = [1, 1]} : vector<8x8xf32> to vector<8x1xf32>
    %32 = vector.shape_cast %30 : vector<1x1024xi1> to vector<1x1024xi1>
    %33 = vector.broadcast %32 : vector<1x1024xi1> to vector<8x1024xi1>
    %34 = vector.shape_cast %31 : vector<8x1xf32> to vector<8x1xf32>
    %35 = vector.broadcast %34 : vector<8x1xf32> to vector<8x1024xf32>
    %36 = arith.select %33, %35, %28 : vector<8x1024xi1>, vector<8x1024xf32>
    %c2_i32 = arith.constant 2 : i32
    %37 = vector.broadcast %c2_i32 : i32 to vector<1x1024xi32>
    %38 = arith.cmpi eq, %19, %37 : vector<1x1024xi32>
    %39 = vector.extract_strided_slice %18 {offsets = [0, 2], sizes = [8, 1], strides = [1, 1]} : vector<8x8xf32> to vector<8x1xf32>
    %40 = vector.shape_cast %38 : vector<1x1024xi1> to vector<1x1024xi1>
    %41 = vector.broadcast %40 : vector<1x1024xi1> to vector<8x1024xi1>
    %42 = vector.shape_cast %39 : vector<8x1xf32> to vector<8x1xf32>
    %43 = vector.broadcast %42 : vector<8x1xf32> to vector<8x1024xf32>
    %44 = arith.select %41, %43, %36 : vector<8x1024xi1>, vector<8x1024xf32>
    %c3_i32 = arith.constant 3 : i32
    %45 = vector.broadcast %c3_i32 : i32 to vector<1x1024xi32>
    %46 = arith.cmpi eq, %19, %45 : vector<1x1024xi32>
    %47 = vector.extract_strided_slice %18 {offsets = [0, 3], sizes = [8, 1], strides = [1, 1]} : vector<8x8xf32> to vector<8x1xf32>
    %48 = vector.shape_cast %46 : vector<1x1024xi1> to vector<1x1024xi1>
    %49 = vector.broadcast %48 : vector<1x1024xi1> to vector<8x1024xi1>
    %50 = vector.shape_cast %47 : vector<8x1xf32> to vector<8x1xf32>
    %51 = vector.broadcast %50 : vector<8x1xf32> to vector<8x1024xf32>
    %52 = arith.select %49, %51, %44 : vector<8x1024xi1>, vector<8x1024xf32>
    %c4_i32 = arith.constant 4 : i32
    %53 = vector.broadcast %c4_i32 : i32 to vector<1x1024xi32>
    %54 = arith.cmpi eq, %19, %53 : vector<1x1024xi32>
    %55 = vector.extract_strided_slice %18 {offsets = [0, 4], sizes = [8, 1], strides = [1, 1]} : vector<8x8xf32> to vector<8x1xf32>
    %56 = vector.shape_cast %54 : vector<1x1024xi1> to vector<1x1024xi1>
    %57 = vector.broadcast %56 : vector<1x1024xi1> to vector<8x1024xi1>
    %58 = vector.shape_cast %55 : vector<8x1xf32> to vector<8x1xf32>
    %59 = vector.broadcast %58 : vector<8x1xf32> to vector<8x1024xf32>
    %60 = arith.select %57, %59, %52 : vector<8x1024xi1>, vector<8x1024xf32>
    %c5_i32 = arith.constant 5 : i32
    %61 = vector.broadcast %c5_i32 : i32 to vector<1x1024xi32>
    %62 = arith.cmpi eq, %19, %61 : vector<1x1024xi32>
    %63 = vector.extract_strided_slice %18 {offsets = [0, 5], sizes = [8, 1], strides = [1, 1]} : vector<8x8xf32> to vector<8x1xf32>
    %64 = vector.shape_cast %62 : vector<1x1024xi1> to vector<1x1024xi1>
    %65 = vector.broadcast %64 : vector<1x1024xi1> to vector<8x1024xi1>
    %66 = vector.shape_cast %63 : vector<8x1xf32> to vector<8x1xf32>
    %67 = vector.broadcast %66 : vector<8x1xf32> to vector<8x1024xf32>
    %68 = arith.select %65, %67, %60 : vector<8x1024xi1>, vector<8x1024xf32>
    %c6_i32 = arith.constant 6 : i32
    %69 = vector.broadcast %c6_i32 : i32 to vector<1x1024xi32>
    %70 = arith.cmpi eq, %19, %69 : vector<1x1024xi32>
    %71 = vector.extract_strided_slice %18 {offsets = [0, 6], sizes = [8, 1], strides = [1, 1]} : vector<8x8xf32> to vector<8x1xf32>
    %72 = vector.shape_cast %70 : vector<1x1024xi1> to vector<1x1024xi1>
    %73 = vector.broadcast %72 : vector<1x1024xi1> to vector<8x1024xi1>
    %74 = vector.shape_cast %71 : vector<8x1xf32> to vector<8x1xf32>
    %75 = vector.broadcast %74 : vector<8x1xf32> to vector<8x1024xf32>
    %76 = arith.select %73, %75, %68 : vector<8x1024xi1>, vector<8x1024xf32>
    %c7_i32 = arith.constant 7 : i32
    %77 = vector.broadcast %c7_i32 : i32 to vector<1x1024xi32>
    %78 = arith.cmpi eq, %19, %77 : vector<1x1024xi32>
    %79 = vector.extract_strided_slice %18 {offsets = [0, 7], sizes = [8, 1], strides = [1, 1]} : vector<8x8xf32> to vector<8x1xf32>
    %80 = vector.shape_cast %78 : vector<1x1024xi1> to vector<1x1024xi1>
    %81 = vector.broadcast %80 : vector<1x1024xi1> to vector<8x1024xi1>
    %82 = vector.shape_cast %79 : vector<8x1xf32> to vector<8x1xf32>
    %83 = vector.broadcast %82 : vector<8x1xf32> to vector<8x1024xf32>
    %84 = arith.select %81, %83, %76 : vector<8x1024xi1>, vector<8x1024xf32>
    %c0_13 = arith.constant 0 : index
    %c0_14 = arith.constant 0 : index
    %85 = vector.load %arg6[%c0_13, %c0_14] : memref<8x1024xf32, #tpu.memory_space<vmem>>, vector<8x1024xf32>
    tpu.vector_store %arg6[%c0_13, %c0_14], %84 {strides = array<i32>} : memref<8x1024xf32, #tpu.memory_space<vmem>>, vector<8x1024xf32>,
    return
  }
  func.func @transform_0(%arg0: i32) -> (i32, i32) {
    %c0_i32 = arith.constant 0 : i32
    %c0_i32_0 = arith.constant 0 : i32
    %c0_i32_1 = arith.constant 0 : i32
    return %c0_i32, %c0_i32_0 : i32, i32
  }
  func.func @transform_1(%arg0: i32) -> (i32, i32) {
    %c0_i32 = arith.constant 0 : i32
    %c0_i32_0 = arith.constant 0 : i32
    %c0_i32_1 = arith.constant 0 : i32
    return %c0_i32, %c0_i32_0 : i32, i32
  }
  func.func @transform_2(%arg0: i32) -> (i32, i32) {
    %c0_i32 = arith.constant 0 : i32
    %c0_i32_0 = arith.constant 0 : i32
    %c0_i32_1 = arith.constant 0 : i32
    return %c0_i32, %c0_i32_0 : i32, i32
  }
  func.func @transform_3(%arg0: i32) -> (i32, i32) {
    %c0_i32 = arith.constant 0 : i32
    %c0_i32_0 = arith.constant 0 : i32
    %c0_i32_1 = arith.constant 0 : i32
    return %c0_i32, %c0_i32_0 : i32, i32
  }
  func.func @transform_4(%arg0: i32) -> (i32, i32) {
    %c0_i32 = arith.constant 0 : i32
    %c0_i32_0 = arith.constant 0 : i32
    return %c0_i32, %arg0 : i32, i32
  }
  func.func @transform_5(%arg0: i32) -> (i32, i32) {
    %c0_i32 = arith.constant 0 : i32
    %c0_i32_0 = arith.constant 0 : i32
    return %c0_i32, %arg0 : i32, i32
  }
}

</mosaic_0001>

<bundles_post_ra>
// kernel: tpu_custom_call.1
= control target key start
LH: loop header
LB: loop body
LE: loop exit
PB: predicated region body
PF: predicated region fallthrough
CT: control target
= control target key end

     0   :  { %10 = vsyncpa [#allocation3], 0  ;;  %s1361_s0 = inlined_call_operand.vmem [shape: f32[8,1], index: 0, kind: input, shape index: {}]   ;;  %s1362_s1 = inlined_call_operand.hbm [shape: f32[1,128], index: 1, kind: input, shape index: {}]   ;;  %s1363_s2 = inlined_call_operand.hbm [shape: f32[1,128], index: 2, kind: input, shape index: {}]   ;;  %s1364_s3 = inlined_call_operand.vmem [shape: f32[8,128], index: 3, kind: input, shape index: {}]   ;;  %s1365_s4 = inlined_call_operand.vmem [shape: s32[1,1024], index: 4, kind: input, shape index: {}]   ;;  %s1366_s5 = inlined_call_operand.hbm [shape: f32[8,1024], index: 5, kind: output, shape index: {}]  }
   0x1   :  { %11 = vsyncpa [#allocation6], 0 }
   0x2   :  { %12 = vsyncpa [#allocation4], 0  ;;  %s712_s18 = smov [#allocation2]   ;;  %s713_s20 = smov [#allocation5]  }
   0x3   :  { %s21_s19 = sshll.u32 %s712_s18, 4  ;;  %s31_s21 = sshll.u32 %s713_s20, 4  ;;  %s22_s19 = int_to_ptr.vmem [resolvable:$true] %s21_s19  ;;  %s32_s21 = int_to_ptr.vmem [resolvable:$true] %s31_s21 }
   0x4   :  { %s640_s24 = scalar_lea.hbm %s1362_s1, 16 }
   0x5   :  { %p641_p0 = scmp.ne.s32.totalorder %s1362_s1, %s640_s24  ;;  %p644_p1 = scmp.lt.u32.totalorder %s640_s24, %s1362_s1 }
   0x7   :  { %p646_p2 = pnand %p644_p1, %p641_p0 }
   0x9   :  { %649 = shalt.err (!%p646_p2)
}
   0xa   :  { %s650_s29 = scalar_lea.vmem %s22_s19, 16  ;;  %s654_s30 = scalar_lea.vmem %s22_s19, 32 }
   0xb   :  { %p651_p3 = scmp.ne.s32.totalorder %s22_s19, %s650_s29  ;;  %p655_p4 = scmp.lt.s32.totalorder %s22_s19, %s22_s19 }
   0xc   :  { %p656_p5 = scmp.lt.s32.totalorder %s654_s30, %s650_s29 }
   0xe   :  { %p657_p6 = por %p656_p5, %p655_p4 }
  0x10   :  { %p658_p7 = pnand %p657_p6, %p651_p3 }
  0x12   :  { %661 = shalt.err (!%p658_p7)
}
  0x13   :  { %24 = dma.hbm_to_vmem [thread:$0]  %s1362_s1, 16, %s22_s19, [#allocation3]  }
  0x14   :  { %s662_s10 = scalar_lea.hbm %s1363_s2, 16 }
  0x15   :  { %p663_p8 = scmp.ne.s32.totalorder %s1363_s2, %s662_s10  ;;  %p666_p9 = scmp.lt.u32.totalorder %s662_s10, %s1363_s2 }
  0x17   :  { %p668_p10 = pnand %p666_p9, %p663_p8 }
  0x19   :  { %671 = shalt.err (!%p668_p10)
}
  0x1a   :  { %s672_s15 = scalar_lea.vmem %s32_s21, 16  ;;  %s676_s16 = scalar_lea.vmem %s32_s21, 32 }
  0x1b   :  { %p673_p11 = scmp.ne.s32.totalorder %s32_s21, %s672_s15  ;;  %p677_p12 = scmp.lt.s32.totalorder %s32_s21, %s32_s21 }
  0x1c   :  { %p678_p13 = scmp.lt.s32.totalorder %s676_s16, %s672_s15 }
  0x1e   :  { %p679_p0 = por %p678_p13, %p677_p12 }
  0x20   :  { %p680_p1 = pnand %p679_p0, %p673_p11 }
  0x22   :  { %683 = shalt.err (!%p680_p1)
}
  0x23   :  { %34 = dma.hbm_to_vmem [thread:$0]  %s1363_s2, 16, %s32_s21, [#allocation6]  }
  0x24   :  { %706 = dma.done.wait [#allocation3], 16  }
  0x25   :  { %707 = vsyncadd [#allocation3], 4294967280 }
  0x26   :  { %708 = dma.done.wait [#allocation6], 16  }
  0x27   :  { %709 = vsyncadd [#allocation6], 4294967280  ;;  %v714_v0 = vmov 0   ;;  %v45_v1 = vld [vmem:[%s1361_s0] sm:$0xff]  ;;  %v715_v2 = vmov 0.0   ;;  %vm716_vm0 = vmmov 0   ;;  %v149_v24 = vlaneseq }
  0x28   :  { %627 = vset.pattern.permute.xlu0 %v714_v0  ;;  %609 = vmatprep.subr.mxu0 %v715_v2  ;;  %v604_v3 = vld [vmem:[#allocation2] ss:$0 sm:$0xff]  ;;  %v605_v5 = vld [vmem:[#allocation5] ss:$0 sm:$0xff]  ;;  %v68_v9 = vld [vmem:[%s1364_s3] sm:$0xff]  ;;  %v717_v10 = vmov 1  }
  0x29   :  { %49 = vperm.xlu0 %627, %v45_v1   ;;  %611 = vmatprep.mubr.msk.f32.mxu0 %vm716_vm0, %v715_v2  ;;  %v718_v18 = vmov 2   ;;  %v719_v19 = vmov 3   ;;  %v720_v20 = vmov 4   ;;  %v721_v21 = vmov 6   ;;  %v789_v25 = vld [vmem:[%s1365_s4] sm:$0xff]  ;;  %s724_s4 = smov [#allocation7]  }
  0x2a   :  { %628 = vset.pattern.permute.xlu1 %v717_v10  ;;  %v722_v22 = vmov 5   ;;  %v723_v23 = vmov 7   ;;  %v150_v26 = vshrl.u32 %v149_v24, 7  ;;  %vm147_vm1 = vcmp.eq.s32.totalorder %v789_v25, 0  ;;  %s594_s21 = sshll.u32 %s724_s4, 4  ;;  %s595_s21 = int_to_ptr.vmem [resolvable:$true] %s594_s21 }
  0x2b   :  { %vm202_vm2 = vcmp.eq.s32.totalorder %v789_v25, 1  ;;  %v148_v30 = vsel %vm147_vm1, 1, %v714_v0  ;;  %vm256_vm3 = vcmp.eq.s32.totalorder %v789_v25, 2  ;;  %vm310_vm4 = vcmp.eq.s32.totalorder %v789_v25, 3  ;;  %s684_s22 = scalar_lea.vmem %s595_s21, 1024  ;;  %p689_p3 = scmp.lt.s32.totalorder %s595_s21, %s595_s21 }
  0x2c   :  { %v793_v27 = vsub.s32 0, %v150_v26  ;;  %v795_v28 = vsub.s32 1, %v150_v26  ;;  %v797_v29 = vsub.s32 2, %v150_v26  ;;  %v800_v31 = vsub.s32 3, %v150_v26  ;;  %p685_p2 = scmp.ne.s32.totalorder %s595_s21, %s684_s22  ;;  %p690_p4 = scmp.lt.s32.totalorder %s684_s22, %s684_s22 }
  0x2d   :  { %v802_v32 = vsub.s32 4, %v150_v26  ;;  %v804_v33 = vsub.s32 5, %v150_v26  ;;  %v806_v34 = vsub.s32 6, %v150_v26  ;;  %v808_v35 = vsub.s32 7, %v150_v26 }
  0x2e   :  { %v203_v36 = vsel %vm202_vm2, 1, %v714_v0  ;;  %v152_v37 = vrot.slane %v148_v30, %v793_v27  ;;  %v156_v38 = vrot.slane %v148_v30, %v795_v28  ;;  %v160_v39 = vrot.slane %v148_v30, %v797_v29  ;;  %p691_p5 = por %p690_p4, %p689_p3 }
  0x2f   :  { %v164_v40 = vrot.slane %v148_v30, %v800_v31  ;;  %v168_v41 = vrot.slane %v148_v30, %v802_v32  ;;  %v172_v42 = vrot.slane %v148_v30, %v804_v33  ;;  %v176_v43 = vrot.slane %v148_v30, %v806_v34 }
  0x30   :  { %v180_v44 = vrot.slane %v148_v30, %v808_v35  ;;  %v207_v45 = vrot.slane %v203_v36, %v793_v27  ;;  %v823_v46 = vsel %vm256_vm3, 1, %v714_v0  ;;  %v211_v47 = vrot.slane %v203_v36, %v795_v28  ;;  %p692_p6 = pnand %p691_p5, %p685_p2 }
  0x31   :  { %v215_v48 = vrot.slane %v203_v36, %v797_v29  ;;  %v219_v49 = vrot.slane %v203_v36, %v800_v31  ;;  %v223_v50 = vrot.slane %v203_v36, %v802_v32  ;;  %v227_v51 = vrot.slane %v203_v36, %v804_v33 }
  0x32   :  { %v231_v52 = vrot.slane %v203_v36, %v806_v34  ;;  %v832_v53 = vsel %vm310_vm4, 1, %v714_v0  ;;  %vm364_vm5 = vcmp.eq.s32.totalorder %v789_v25, 4  ;;  %v235_v54 = vrot.slane %v203_v36, %v808_v35 }
  0x33   :  { %v261_v55 = vrot.slane %v823_v46, %v793_v27  ;;  %v265_v56 = vrot.slane %v823_v46, %v795_v28  ;;  %v269_v57 = vrot.slane %v823_v46, %v797_v29  ;;  %v273_v58 = vrot.slane %v823_v46, %v800_v31 }
  0x34   :  { %v277_v59 = vrot.slane %v823_v46, %v802_v32  ;;  %v281_v60 = vrot.slane %v823_v46, %v804_v33  ;;  %vm418_vm6 = vcmp.eq.s32.totalorder %v789_v25, 5  ;;  %vm849_vm7 = vcmp.eq.s32.totalorder %v152_v37, 1 }
  0x35   :  { %vm853_vm8 = vcmp.eq.s32.totalorder %v156_v38, 1  ;;  %vm857_vm9 = vcmp.eq.s32.totalorder %v160_v39, 1  ;;  %vm861_vm10 = vcmp.eq.s32.totalorder %v164_v40, 1  ;;  %v285_v2 = vrot.slane %v823_v46, %v806_v34 }
  0x36   :  { %vm876_vm11 = vcmp.eq.s32.totalorder %v168_v41, 1  ;;  %vm880_vm12 = vcmp.eq.s32.totalorder %v172_v42, 1  ;;  %vm884_vm13 = vcmp.eq.s32.totalorder %v176_v43, 1  ;;  %vm888_vm14 = vcmp.eq.s32.totalorder %v180_v44, 1 }
  0x37   :  { %v319_v10 = vrot.slane %v832_v53, %v795_v28  ;;  %vm910_vm0 = vcmp.eq.s32.totalorder %v207_v45, 1  ;;  %vm914_vm1 = vcmp.eq.s32.totalorder %v211_v47, 1  ;;  %vm918_vm2 = vcmp.eq.s32.totalorder %v215_v48, 1 }
  0x38   :  { %vm922_vm3 = vcmp.eq.s32.totalorder %v219_v49, 1  ;;  %v1401_v24 = vmov 0  ;;  %v1403_v26 = vmov 0  ;;  %vm941_vm15 = vcmp.eq.s32.totalorder %v231_v52, 1 }
  0x39   :  { %v1405_v30 = vmov 0  ;;  %v1407_v36 = vmov 0  ;;  %vm957_vm4 = vcmp.eq.s32.totalorder %v261_v55, 1  ;;  %v1409_v41 = vmov 0 }
  0x3a   :  { %v1406_v30 = vsel %vm941_vm15, 4294967295, %v1405_v30  ;;  %v1410_v41 = vsel %vm957_vm4, 4294967295, %v1409_v41  ;;  %vm961_vm15 = vcmp.eq.s32.totalorder %v265_v56, 1  ;;  %v1411_v42 = vmov 0 }
  0x3b   :  { %v1412_v42 = vsel %vm961_vm15, 4294967295, %v1411_v42  ;;  %v1413_v43 = vmov 0  ;;  %v1415_v44 = vmov 0  ;;  %vm1417_vm15 = vcmp.eq.s32.totalorder %v789_v25, 6 }
  0x3c   :  { %v982_v48 = vsel %vm1417_vm15, 1, %v714_v0  ;;  %vm984_vm4 = vcmp.eq.s32.totalorder %v277_v59, 1  ;;  %v1418_v49 = vmov 0  ;;  %v1425_v52 = vmov 0 }
  0x3d   :  { %v1419_v49 = vsel %vm984_vm4, 4294967295, %v1418_v49  ;;  %vm1428_vm15 = vcmp.eq.s32.totalorder %v789_v25, 7  ;;  %v481_v25 = vrot.slane %v982_v48, %v795_v28 }
  0xa8   :  { %v50_v4 = vpop.permute.xlu0 %49 }
  0xa9   :  { %v58_v6 = vmul.f32 %v604_v3, %v50_v4  ;;  %v289_v3 = vrot.slane %v823_v46, %v808_v35  ;;  %v315_v4 = vrot.slane %v832_v53, %v793_v27 }
  0xab   :  { %v66_v7 = vadd.f32 %v605_v5, %v58_v6  ;;  %v874_v5 = vsel %vm364_vm5, 1, %v714_v0  ;;  %vm933_vm5 = vcmp.eq.s32.totalorder %v223_v50, 1  ;;  %v1420_v50 = vmov 0 }
  0xac   :  { %v1402_v24 = vsel %vm933_vm5, 4294967295, %v1401_v24  ;;  %v377_v37 = vrot.slane %v874_v5, %v797_v29  ;;  %v381_v38 = vrot.slane %v874_v5, %v800_v31  ;;  %v385_v39 = vrot.slane %v874_v5, %v802_v32 }
  0xad   :  { %v67_v8 = vmax.f32 %v66_v7, 0.0  ;;  %v389_v40 = vrot.slane %v874_v5, %v804_v33  ;;  %v393_v45 = vrot.slane %v874_v5, %v806_v34  ;;  %v397_v46 = vrot.slane %v874_v5, %v808_v35 }
  0xae   :  { %vm996_vm5 = vcmp.eq.s32.totalorder %v289_v3, 1 }
  0xaf   :  { %610 = vmatpush3.xpose.msra.mxu0 %v67_v8  ;;  %v1426_v52 = vsel %vm996_vm5, 4294967295, %v1425_v52  ;;  %vm1021_vm5 = vcmp.eq.s32.totalorder %v315_v4, 1  ;;  %v485_v4 = vrot.slane %v982_v48, %v797_v29  ;;  %v1477_v8 = vmov 0 }
  0xb0   :  { %1427 = vst [vmem:[#allocation12_spill] sm:$0xff] %v1426_v52  ;;  %v1431_v52 = vmov 0 }
  0xb2   :  { %612 = vmatmul.mubr.f32.vlgmr.msra.gmra.mrb[0].mxu0 %v68_v9  ;;  %v1479_v9 = vmov 0 }
 0x185   :  { %v135_v11 = vpop.f32.mrb[0].mxu0 }
 0x186   :  { %v606_v12 = vmul.f32 -1.442695, %v135_v11  ;;  %v613_v13 = vpop.f32.mrb[1].mxu0  ;;  %v323_v11 = vrot.slane %v832_v53, %v797_v29 }
 0x187   :  { %v331_v13 = vrot.slane %v832_v53, %v802_v32 }
 0x188   :  { %636 = vpow2.f32 %v606_v12  ;;  %v327_v12 = vrot.slane %v832_v53, %v800_v31 }
 0x18a   :  { %vm1033_vm4 = vcmp.eq.s32.totalorder %v327_v12, 1  ;;  %v1443_v12 = vmov 0 }
 0x192   :  { %v637_v14 = vpop.eup %636 }
 0x193   :  { %v142_v15 = vadd.f32 1.0, %v637_v14  ;;  %v335_v14 = vrot.slane %v832_v53, %v804_v33 }
 0x195   :  { %638 = vrcp.f32 %v142_v15  ;;  %v339_v15 = vrot.slane %v832_v53, %v806_v34 }
 0x19f   :  { %v639_v16 = vpop.eup %638 }
 0x1a0   :  { %v145_v17 = vmul.f32 16.0, %v639_v16  ;;  %v907_v16 = vsel %vm418_vm6, 1, %v714_v0  ;;  %vm937_vm6 = vcmp.eq.s32.totalorder %v227_v51, 1  ;;  %v1422_v51 = vmov 0 }
 0x1a1   :  { %v1404_v26 = vsel %vm937_vm6, 4294967295, %v1403_v26  ;;  %vm969_vm6 = vcmp.eq.s32.totalorder %v273_v58, 1  ;;  %v423_v47 = vrot.slane %v907_v16, %v793_v27  ;;  %v435_v55 = vrot.slane %v907_v16, %v800_v31 }
 0x1a2   :  { %245 = vperm.xlu1 %628, %v145_v17   ;;  %191 = vperm.xlu0 %627, %v145_v17   ;;  %v1416_v44 = vsel %vm969_vm6, 4294967295, %v1415_v44  ;;  %vm992_vm6 = vcmp.eq.s32.totalorder %v285_v2, 1  ;;  %v439_v56 = vrot.slane %v907_v16, %v802_v32  ;;  %v443_v58 = vrot.slane %v907_v16, %v804_v33 }
 0x1a3   :  { %v1423_v51 = vsel %vm992_vm6, 4294967295, %v1422_v51  ;;  %v447_v59 = vrot.slane %v907_v16, %v806_v34  ;;  %v1019_v2 = vsel %vm1428_vm15, 1, %v714_v0  ;;  %vm1025_vm6 = vcmp.eq.s32.totalorder %v319_v10, 1 }
 0x1a4   :  { %1424 = vst [vmem:[#allocation11_spill] sm:$0xff] %v1423_v51  ;;  %v1432_v52 = vsel %vm1025_vm6, 4294967295, %v1431_v52  ;;  %v1434_v51 = vmov 0  ;;  %v477_v0 = vrot.slane %v982_v48, %v793_v27  ;;  %v489_v10 = vrot.slane %v982_v48, %v800_v31 }
 0x1a5   :  { %1433 = vst [vmem:[#allocation13_spill] sm:$0xff] %v1432_v52  ;;  %vm1045_vm15 = vcmp.eq.s32.totalorder %v331_v13, 1  ;;  %v493_v52 = vrot.slane %v982_v48, %v802_v32  ;;  %v497_v13 = vrot.slane %v982_v48, %v804_v33 }
 0x1a6   :  { %629 = vset.pattern.permute.xlu1 %v718_v18  ;;  %630 = vset.pattern.permute.xlu0 %v719_v19  ;;  %v1490_v19 = vmov 0 }
 0x1a7   :  { %299 = vperm.xlu1 %629, %v145_v17   ;;  %353 = vperm.xlu0 %630, %v145_v17  }
 0x1ab   :  { %631 = vset.pattern.permute.xlu1 %v720_v20  ;;  %633 = vset.pattern.permute.xlu0 %v721_v21  ;;  %v1399_v20 = vmov 0  ;;  %v343_v21 = vrot.slane %v832_v53, %v808_v35  ;;  %v427_v53 = vrot.slane %v907_v16, %v795_v28 }
 0x1ac   :  { %407 = vperm.xlu1 %631, %v145_v17   ;;  %515 = vperm.xlu0 %633, %v145_v17   ;;  %v1400_v20 = vsel %vm922_vm3, 4294967295, %v1399_v20  ;;  %vm945_vm3 = vcmp.eq.s32.totalorder %v235_v54, 1  ;;  %v431_v54 = vrot.slane %v907_v16, %v797_v29 }
 0x1ad   :  { %v1408_v36 = vsel %vm945_vm3, 4294967295, %v1407_v36  ;;  %vm965_vm3 = vcmp.eq.s32.totalorder %v269_v57, 1  ;;  %vm1057_vm6 = vcmp.eq.s32.totalorder %v343_v21, 1  ;;  %v1454_v21 = vmov 0 }
 0x1ae   :  { %v1414_v43 = vsel %vm965_vm3, 4294967295, %v1413_v43  ;;  %vm988_vm3 = vcmp.eq.s32.totalorder %v281_v60, 1  ;;  %v451_v60 = vrot.slane %v907_v16, %v808_v35  ;;  %v1437_v16 = vmov 0 }
 0x1af   :  { %v1421_v50 = vsel %vm988_vm3, 4294967295, %v1420_v50  ;;  %vm1029_vm3 = vcmp.eq.s32.totalorder %v323_v11, 1  ;;  %v1438_v16 = vsel %vm1033_vm4, 4294967295, %v1437_v16  ;;  %v1440_v11 = vmov 0 }
 0x1b0   :  { %632 = vset.pattern.permute.xlu1 %v722_v22  ;;  %635 = vset.pattern.permute.xlu0 %v723_v23  ;;  %v369_v22 = vrot.slane %v874_v5, %v793_v27  ;;  %v1435_v51 = vsel %vm1029_vm3, 4294967295, %v1434_v51  ;;  %1439 = vst [vmem:[#allocation15_spill] sm:$0xff] %v1438_v16  ;;  %v1441_v11 = vsel %vm1045_vm15, 4294967295, %v1440_v11  ;;  %vm1049_vm3 = vcmp.eq.s32.totalorder %v335_v14, 1 }
 0x1b1   :  { %461 = vperm.xlu1 %632, %v145_v17   ;;  %1436 = vst [vmem:[#allocation14_spill] sm:$0xff] %v1435_v51  ;;  %1442 = vst [vmem:[#allocation16_spill] sm:$0xff] %v1441_v11  ;;  %v1444_v12 = vsel %vm1049_vm3, 4294967295, %v1443_v12  ;;  %vm1053_vm4 = vcmp.eq.s32.totalorder %v339_v15, 1  ;;  %v1446_v16 = vmov 0  ;;  %v1449_v51 = vmov 0 }
 0x1b2   :  { %1445 = vst [vmem:[#allocation17_spill] sm:$0xff] %v1444_v12  ;;  %v1447_v16 = vsel %vm1053_vm4, 4294967295, %v1446_v16  ;;  %v1450_v51 = vsel %vm1057_vm6, 4294967295, %v1449_v51  ;;  %v501_v14 = vrot.slane %v982_v48, %v806_v34  ;;  %v505_v12 = vrot.slane %v982_v48, %v808_v35 }
 0x1b3   :  { %1448 = vst [vmem:[#allocation18_spill] sm:$0xff] %v1447_v16  ;;  %1451 = vst [vmem:[#allocation19_spill] sm:$0xff] %v1450_v51  ;;  %vm1069_vm3 = vcmp.eq.s32.totalorder %v369_v22, 1  ;;  %vm1077_vm6 = vcmp.eq.s32.totalorder %v377_v37, 1  ;;  %v1456_v51 = vmov 0  ;;  %vm1081_vm15 = vcmp.eq.s32.totalorder %v381_v38, 1 }
 0x1b4   :  { %v1457_v51 = vsel %vm1077_vm6, 4294967295, %v1456_v51  ;;  %v1458_v16 = vmov 0  ;;  %v531_v11 = vrot.slane %v1019_v2, %v793_v27  ;;  %v535_v22 = vrot.slane %v1019_v2, %v795_v28 }
 0x1b5   :  { %634 = vset.pattern.permute.xlu1 %v723_v23  ;;  %v373_v23 = vrot.slane %v874_v5, %v795_v28  ;;  %v1459_v16 = vsel %vm1081_vm15, 4294967295, %v1458_v16  ;;  %v543_v48 = vrot.slane %v1019_v2, %v800_v31  ;;  %vm1101_vm15 = vcmp.eq.s32.totalorder %v385_v39, 1 }
 0x1b6   :  { %569 = vperm.xlu1 %634, %v145_v17   ;;  %1460 = vst [vmem:[#allocation20_spill] sm:$0xff] %v1459_v16  ;;  %vm1105_vm6 = vcmp.eq.s32.totalorder %v389_v40, 1 }
 0x1b7   :  { %vm1073_vm4 = vcmp.eq.s32.totalorder %v373_v23, 1  ;;  %v539_v23 = vrot.slane %v1019_v2, %v797_v29 }
 0x1b8   :  { %v1455_v21 = vsel %vm1073_vm4, 4294967295, %v1454_v21  ;;  %vm1109_vm4 = vcmp.eq.s32.totalorder %v393_v45, 1 }
 0x1ba   :  { %v1536_v5 = vld [vmem:[#allocation19_spill] sm:$0xff] }
 0x221   :  { %v1008_v57 = vpop.permute.xlu1 %245  ;;  %v192_v3 = vpop.permute.xlu0 %191 }
 0x222   :  { %v194_v37 = vsel %vm849_vm7, %v192_v3, 0.0  ;;  %v195_v38 = vsel %vm853_vm8, %v192_v3, 0.0  ;;  %v196_v16 = vsel %vm857_vm9, %v192_v3, 0.0  ;;  %v197_v27 = vsel %vm861_vm10, %v192_v3, 0.0 }
 0x223   :  { %vm1113_vm7 = vcmp.eq.s32.totalorder %v397_v46, 1  ;;  %v198_v62 = vsel %vm876_vm11, %v192_v3, 0.0  ;;  %v199_v63 = vsel %vm880_vm12, %v192_v3, 0.0  ;;  %v200_v1 = vsel %vm884_vm13, %v192_v3, 0.0 }
 0x224   :  { %v201_v39 = vsel %vm888_vm14, %v192_v3, 0.0  ;;  %vm1125_vm8 = vcmp.eq.s32.totalorder %v423_v47, 1  ;;  %vm1129_vm9 = vcmp.eq.s32.totalorder %v427_v53, 1  ;;  %v1471_v46 = vmov 0 }
 0x225   :  { %v1472_v46 = vsel %vm1129_vm9, 4294967295, %v1471_v46  ;;  %vm1133_vm10 = vcmp.eq.s32.totalorder %v431_v54, 1  ;;  %vm1137_vm11 = vcmp.eq.s32.totalorder %v435_v55, 1  ;;  %vm1141_vm12 = vcmp.eq.s32.totalorder %v439_v56, 1 }
 0x226   :  { %v300_v40 = vpop.permute.xlu1 %299  ;;  %v1478_v8 = vsel %vm1141_vm12, 4294967295, %v1477_v8  ;;  %vm1145_vm13 = vcmp.eq.s32.totalorder %v443_v58, 1  ;;  %vm1149_vm14 = vcmp.eq.s32.totalorder %v447_v59, 1  ;;  %v1481_v47 = vmov 0  ;;  %v354_v3 = vpop.permute.xlu0 %353 }
 0x227   :  { %v1480_v9 = vsel %vm1145_vm13, 4294967295, %v1479_v9  ;;  %v1482_v47 = vsel %vm1149_vm14, 4294967295, %v1481_v47  ;;  %vm1153_vm9 = vcmp.eq.s32.totalorder %v451_v60, 1  ;;  %v1483_v53 = vmov 0 }
 0x228   :  { %v1484_v53 = vsel %vm1153_vm9, 4294967295, %v1483_v53  ;;  %v547_v54 = vrot.slane %v1019_v2, %v802_v32  ;;  %v551_v55 = vrot.slane %v1019_v2, %v804_v33  ;;  %v555_v56 = vrot.slane %v1019_v2, %v806_v34 }
 0x229   :  { %v559_v58 = vrot.slane %v1019_v2, %v808_v35  ;;  %v248_v59 = vsel %vm910_vm0, %v1008_v57, %v194_v37  ;;  %v249_v60 = vsel %vm914_vm1, %v1008_v57, %v195_v38  ;;  %v250_v32 = vsel %vm918_vm2, %v1008_v57, %v196_v16  ;;  %v1524_v38 = vld [vmem:[#allocation13_spill] sm:$0xff] }
 0x22a   :  { %vm1485_vm9 = vnez %v1400_v20  ;;  %vm1486_vm14 = vnez %v1402_v24  ;;  %vm1487_vm13 = vnez %v1404_v26  ;;  %vm1488_vm0 = vnez %v1406_v30 }
 0x22b   :  { %v251_v33 = vsel %vm1485_vm9, %v1008_v57, %v197_v27  ;;  %v252_v34 = vsel %vm1486_vm14, %v1008_v57, %v198_v62  ;;  %v253_v35 = vsel %vm1487_vm13, %v1008_v57, %v199_v63  ;;  %v254_v17 = vsel %vm1488_vm0, %v1008_v57, %v200_v1  ;;  %v1526_v27 = vld [vmem:[#allocation14_spill] sm:$0xff]  ;;  %v1528_v62 = vld [vmem:[#allocation15_spill] sm:$0xff] }
 0x22c   :  { %vm1489_vm1 = vnez %v1408_v36  ;;  %vm1189_vm2 = vcmp.eq.s32.totalorder %v477_v0, 1  ;;  %vm1193_vm9 = vcmp.eq.s32.totalorder %v481_v25, 1  ;;  %v1492_v20 = vmov 0 }
 0x22d   :  { %v255_v18 = vsel %vm1489_vm1, %v1008_v57, %v201_v39  ;;  %v1491_v19 = vsel %vm1189_vm2, 4294967295, %v1490_v19  ;;  %v1493_v20 = vsel %vm1193_vm9, 4294967295, %v1492_v20  ;;  %vm1197_vm14 = vcmp.eq.s32.totalorder %v485_v4, 1  ;;  %v1514_v4 = vld [vmem:[#allocation12_spill] sm:$0xff]  ;;  %v1532_v39 = vld [vmem:[#allocation17_spill] sm:$0xff] }
 0x22e   :  { %v1494_v24 = vmov 0  ;;  %vm1201_vm13 = vcmp.eq.s32.totalorder %v489_v10, 1  ;;  %v1496_v26 = vmov 0  ;;  %vm1498_vm0 = vnez %v1410_v41 }
 0x22f   :  { %v1495_v24 = vsel %vm1197_vm14, 4294967295, %v1494_v24  ;;  %v1497_v26 = vsel %vm1201_vm13, 4294967295, %v1496_v26  ;;  %v302_v30 = vsel %vm1498_vm0, %v300_v40, %v248_v59  ;;  %vm1499_vm1 = vnez %v1412_v42 }
 0x230   :  { %v303_v36 = vsel %vm1499_vm1, %v300_v40, %v249_v60  ;;  %vm1500_vm2 = vnez %v1414_v43  ;;  %vm1501_vm12 = vnez %v1416_v44  ;;  %vm1213_vm9 = vcmp.eq.s32.totalorder %v493_v52, 1  ;;  %v1512_v52 = vld [vmem:[#allocation11_spill] sm:$0xff] }
 0x231   :  { %v304_v57 = vsel %vm1500_vm2, %v300_v40, %v250_v32  ;;  %v305_v2 = vsel %vm1501_vm12, %v300_v40, %v251_v33  ;;  %v1502_v16 = vmov 0  ;;  %vm1217_vm14 = vcmp.eq.s32.totalorder %v497_v13, 1  ;;  %v408_v13 = vpop.permute.xlu1 %407 }
 0x232   :  { %v1503_v16 = vsel %vm1213_vm9, 4294967295, %v1502_v16  ;;  %v1504_v0 = vmov 0  ;;  %vm1221_vm13 = vcmp.eq.s32.totalorder %v501_v14, 1  ;;  %v1506_v41 = vmov 0 }
 0x233   :  { %v1505_v0 = vsel %vm1217_vm14, 4294967295, %v1504_v0  ;;  %v1507_v41 = vsel %vm1221_vm13, 4294967295, %v1506_v41  ;;  %vm1225_vm0 = vcmp.eq.s32.totalorder %v505_v12, 1  ;;  %v1508_v42 = vmov 0 }
 0x234   :  { %v1509_v42 = vsel %vm1225_vm0, 4294967295, %v1508_v42  ;;  %vm1510_vm2 = vnez %v1419_v49  ;;  %vm1511_vm12 = vnez %v1421_v50  ;;  %vm1513_vm1 = vnez %v1512_v52 }
 0x235   :  { %v306_v43 = vsel %vm1510_vm2, %v300_v40, %v252_v34  ;;  %v307_v44 = vsel %vm1511_vm12, %v300_v40, %v253_v35  ;;  %v308_v25 = vsel %vm1513_vm1, %v300_v40, %v254_v17  ;;  %vm1515_vm9 = vnez %v1514_v4  ;;  %v1540_v35 = vld [vmem:[#allocation20_spill] sm:$0xff] }
 0x236   :  { %v309_v10 = vsel %vm1515_vm9, %v300_v40, %v255_v18  ;;  %vm1237_vm14 = vcmp.eq.s32.totalorder %v531_v11, 1  ;;  %vm1241_vm13 = vcmp.eq.s32.totalorder %v535_v22, 1  ;;  %v1518_v12 = vmov 0  ;;  %v1534_v40 = vld [vmem:[#allocation18_spill] sm:$0xff] }
 0x237   :  { %v1519_v12 = vsel %vm1241_vm13, 4294967295, %v1518_v12  ;;  %vm1245_vm0 = vcmp.eq.s32.totalorder %v539_v23, 1  ;;  %v1520_v49 = vmov 0  ;;  %vm1249_vm2 = vcmp.eq.s32.totalorder %v543_v48, 1  ;;  %v1530_v23 = vld [vmem:[#allocation16_spill] sm:$0xff] }
 0x238   :  { %v1521_v49 = vsel %vm1245_vm0, 4294967295, %v1520_v49  ;;  %v1522_v50 = vmov 0  ;;  %v356_v37 = vsel %vm1021_vm5, %v354_v3, %v302_v30  ;;  %vm1525_vm9 = vnez %v1524_v38 }
 0x239   :  { %v1523_v50 = vsel %vm1249_vm2, 4294967295, %v1522_v50  ;;  %v357_v11 = vsel %vm1525_vm9, %v354_v3, %v303_v36  ;;  %vm1527_vm12 = vnez %v1526_v27  ;;  %vm1529_vm1 = vnez %v1528_v62 }
 0x23a   :  { %v358_v22 = vsel %vm1527_vm12, %v354_v3, %v304_v57  ;;  %v359_v63 = vsel %vm1529_vm1, %v354_v3, %v305_v2  ;;  %vm1531_vm13 = vnez %v1530_v23  ;;  %vm1533_vm0 = vnez %v1532_v39 }
 0x23b   :  { %v360_v1 = vsel %vm1531_vm13, %v354_v3, %v306_v43  ;;  %v361_v48 = vsel %vm1533_vm0, %v354_v3, %v307_v44  ;;  %vm1535_vm2 = vnez %v1534_v40  ;;  %vm1537_vm5 = vnez %v1536_v5 }
 0x23c   :  { %v362_v59 = vsel %vm1535_vm2, %v354_v3, %v308_v25  ;;  %v363_v60 = vsel %vm1537_vm5, %v354_v3, %v309_v10  ;;  %v410_v32 = vsel %vm1069_vm3, %v408_v13, %v356_v37  ;;  %vm1538_vm9 = vnez %v1455_v21  ;;  %v462_v21 = vpop.permute.xlu1 %461 }
 0x23d   :  { %v411_v33 = vsel %vm1538_vm9, %v408_v13, %v357_v11  ;;  %vm1539_vm12 = vnez %v1457_v51  ;;  %vm1541_vm13 = vnez %v1540_v35  ;;  %v414_v18 = vsel %vm1101_vm15, %v408_v13, %v360_v1 }
 0x23e   :  { %v412_v34 = vsel %vm1539_vm12, %v408_v13, %v358_v22  ;;  %v413_v17 = vsel %vm1541_vm13, %v408_v13, %v359_v63  ;;  %v415_v30 = vsel %vm1105_vm6, %v408_v13, %v361_v48  ;;  %v416_v36 = vsel %vm1109_vm4, %v408_v13, %v362_v59 }
 0x23f   :  { %v417_v15 = vsel %vm1113_vm7, %v408_v13, %v363_v60  ;;  %v464_v51 = vsel %vm1125_vm8, %v462_v21, %v410_v32  ;;  %vm1542_vm3 = vnez %v1472_v46  ;;  %v466_v28 = vsel %vm1133_vm10, %v462_v21, %v412_v34  ;;  %v516_v46 = vpop.permute.xlu0 %515 }
 0x240   :  { %v465_v57 = vsel %vm1542_vm3, %v462_v21, %v411_v33  ;;  %v467_v29 = vsel %vm1137_vm11, %v462_v21, %v413_v17  ;;  %vm1543_vm6 = vnez %v1478_v8  ;;  %vm1544_vm4 = vnez %v1480_v9 }
 0x241   :  { %v468_v31 = vsel %vm1543_vm6, %v462_v21, %v414_v18  ;;  %v469_v61 = vsel %vm1544_vm4, %v462_v21, %v415_v30  ;;  %vm1545_vm15 = vnez %v1482_v47  ;;  %vm1546_vm7 = vnez %v1484_v53 }
 0x242   :  { %v470_v2 = vsel %vm1545_vm15, %v462_v21, %v416_v36  ;;  %v471_v45 = vsel %vm1546_vm7, %v462_v21, %v417_v15  ;;  %vm1301_vm8 = vcmp.eq.s32.totalorder %v547_v54, 1  ;;  %vm1305_vm10 = vcmp.eq.s32.totalorder %v551_v55, 1  ;;  %v570_v55 = vpop.permute.xlu1 %569 }
 0x243   :  { %vm1309_vm11 = vcmp.eq.s32.totalorder %v555_v56, 1  ;;  %vm1313_vm0 = vcmp.eq.s32.totalorder %v559_v58, 1  ;;  %vm1555_vm2 = vnez %v1491_v19  ;;  %vm1556_vm1 = vnez %v1493_v20 }
 0x244   :  { %v518_v9 = vsel %vm1555_vm2, %v516_v46, %v464_v51  ;;  %v519_v47 = vsel %vm1556_vm1, %v516_v46, %v465_v57  ;;  %vm1557_vm5 = vnez %v1495_v24  ;;  %vm1558_vm9 = vnez %v1497_v26 }
 0x245   :  { %v520_v53 = vsel %vm1557_vm5, %v516_v46, %v466_v28  ;;  %v521_v54 = vsel %vm1558_vm9, %v516_v46, %v467_v29  ;;  %vm1559_vm12 = vnez %v1503_v16  ;;  %vm1560_vm13 = vnez %v1505_v0 }
 0x246   :  { %v522_v56 = vsel %vm1559_vm12, %v516_v46, %v468_v31  ;;  %v523_v58 = vsel %vm1560_vm13, %v516_v46, %v469_v61  ;;  %vm1561_vm3 = vnez %v1507_v41  ;;  %vm1562_vm6 = vnez %v1509_v42 }
 0x247   :  { %v524_v19 = vsel %vm1561_vm3, %v516_v46, %v470_v2  ;;  %v525_v20 = vsel %vm1562_vm6, %v516_v46, %v471_v45  ;;  %v572_v24 = vsel %vm1237_vm14, %v570_v55, %v518_v9  ;;  %vm1563_vm4 = vnez %v1519_v12 }
 0x248   :  { %v573_v26 = vsel %vm1563_vm4, %v570_v55, %v519_v47  ;;  %vm1564_vm15 = vnez %v1521_v49  ;;  %vm1565_vm7 = vnez %v1523_v50  ;;  %v576_v0 = vsel %vm1301_vm8, %v570_v55, %v522_v56  ;;  %580 = vst [vmem:[#allocation7] sm:$0xff] %v572_v24 }
 0x249   :  { %v574_v43 = vsel %vm1564_vm15, %v570_v55, %v520_v53  ;;  %v575_v16 = vsel %vm1565_vm7, %v570_v55, %v521_v54  ;;  %v577_v41 = vsel %vm1305_vm10, %v570_v55, %v523_v58  ;;  %v578_v42 = vsel %vm1309_vm11, %v570_v55, %v524_v19  ;;  %581 = vst [vmem:[#allocation7 + $0x8] sm:$0xff] %v573_v26 }
 0x24a   :  { %v579_v44 = vsel %vm1313_vm0, %v570_v55, %v525_v20  ;;  %582 = vst [vmem:[#allocation7 + $0x10] sm:$0xff] %v574_v43  ;;  %583 = vst [vmem:[#allocation7 + $0x18] sm:$0xff] %v575_v16 }
 0x24b   :  { %584 = vst [vmem:[#allocation7 + $0x20] sm:$0xff] %v576_v0  ;;  %585 = vst [vmem:[#allocation7 + $0x28] sm:$0xff] %v577_v41 }
 0x24c   :  { %586 = vst [vmem:[#allocation7 + $0x30] sm:$0xff] %v578_v42  ;;  %587 = vst [vmem:[#allocation7 + $0x38] sm:$0xff] %v579_v44 }
 0x24d   :  { %695 = shalt.err (!%p692_p6)
}
 0x24e   :  { %s696_s25 = scalar_lea.hbm %s1366_s5, 1024 }
 0x24f   :  { %p697_p7 = scmp.ne.s32.totalorder %s1366_s5, %s696_s25  ;;  %p700_p8 = scmp.lt.u32.totalorder %s696_s25, %s1366_s5 }
 0x251   :  { %p702_p9 = pnand %p700_p8, %p697_p7 }
 0x253   :  { %705 = shalt.err (!%p702_p9)
}
 0x254   :  { %597 = dma.vmem_to_hbm [thread:$0]  %s595_s21, 1024, %s1366_s5, [#allocation4]  }
 0x255   :  { %710 = dma.done.wait [#allocation4], 1024  }
 0x256   :  { %711 = vsyncadd [#allocation4], 4294966272 }
 0x257   :  { %601 = vsyncpa [#allocation3], 1 }
 0x258   :  { %602 = vsyncpa [#allocation6], 1 }
 0x259   :  { %603 = vsyncpa [#allocation4], 1 }

</bundles_post_ra>
